<compile_context>
chip_gen: v5e
topology: v5e:2x2
jax: 0.10.0
libtpu: 0.0.40
codegen_flags: <defaults>
</compile_context>

<pallas_src>
import math

import jax
import jax.numpy as jnp
from jax.experimental import pallas as pl
from jax.experimental.pallas import tpu as pltpu


# --------------------------------- helpers -----------------------------------
def _round_up(x: int, m: int) -> int:
    return ((x + m - 1) // m) * m


def _cdiv(a: int, b: int) -> int:
    return (a + b - 1) // b


def _vmem_limit_bytes() -> int:
    """Generation-aware VMEM ask (leave headroom for Mosaic internal scratch).

    v7x  (64 MiB physical)  -> 48 MiB
    v5e/v6e (128 MiB)       -> 112 MiB
    """
    cap = 64 * 1024 * 1024
    try:
        info = pltpu.get_tpu_info()
        cap = int(getattr(info, "vmem_capacity_bytes", cap) or cap)
    except Exception:
        pass
    return max(32 * 1024 * 1024, min(cap - 16 * 1024 * 1024, 112 * 1024 * 1024))


def _choose_tm(M: int, tm_req: int) -> int:
    """Row tile: multiple of 8, prefer an exact divisor of M (no padding / no
    output slice) and keep >= 2 row tiles so v7x's two TensorCores both get
    work on the 'parallel' row axis."""
    mp8 = _round_up(M, 8)
    tm = max(8, min((tm_req // 8) * 8, mp8))
    if mp8 > 8:  # leave at least two row tiles when possible
        tm = min(tm, max(8, _round_up(_cdiv(mp8, 2), 8)))
    for cand in range(tm, 7, -8):  # prefer a divisor of M
        if M % cand == 0:
            return cand
    return tm


def _choose_tk(D: int, tk_req: int) -> int:
    """Contraction tile: largest multiple-of-128 divisor of D that is <= tk_req,
    else the full D (no K tiling for tiny / awkward d_model)."""
    upper = min(tk_req, D)
    for cand in range((upper // 128) * 128, 127, -128):
        if D % cand == 0:
            return cand
    return D


def _choose_tv(V: int, tv_req: int):
    """Vocab tile for the two-pass path: a multiple-of-128 divisor of V."""
    upper = min(tv_req, V)
    for cand in range((upper // 128) * 128, 127, -128):
        if V % cand == 0:
            return cand
    return None


# --------------------------------- kernels -----------------------------------
def _fused_kernel(x_ref, w_ref, b_ref, o_ref, acc_ref):
    """Full-vocab path. One (tm, V) output tile; d_model tiled on grid axis 1.

    x_ref : (tm, tk)  bf16 rows tile
    w_ref : (tk, V)   bf16 weight tile (already in (D, V) layout)
    b_ref : (1, V)    f32 bias (resident)
    o_ref : (tm, V)   log-softmax output tile
    acc_ref: (tm, V)  f32 accumulator scratch
    """
    k = pl.program_id(1)
    part = jnp.dot(x_ref[...], w_ref[...], preferred_element_type=jnp.float32)

    @pl.when(k == 0)
    def _():
        acc_ref[...] = part + b_ref[...]          # bias folded into the init

    @pl.when(k != 0)
    def _():
        acc_ref[...] += part

    @pl.when(k == pl.num_programs(1) - 1)
    def _():
        z = acc_ref[...]
        m = jnp.max(z, axis=-1, keepdims=True)
        lse = m + jnp.log(jnp.sum(jnp.exp(z - m), axis=-1, keepdims=True))
        o_ref[...] = (z - lse).astype(o_ref.dtype)


def _tiled_kernel(x_ref, w_ref, b_ref, z_ref, lse_ref, acc_ref, m_ref, l_ref):
    """Vocab-tiled path. Grid (rows, vocab, K); K innermost.

    Emits raw logits tiles plus a per-row log-sum-exp computed online across
    the vocab tiles; the `logits - lse` subtraction is a cheap lane-dense
    second pass outside the kernel.
    """
    j = pl.program_id(1)
    k = pl.program_id(2)

    @pl.when((j == 0) & (k == 0))
    def _():
        m_ref[...] = jnp.full(m_ref.shape, -jnp.inf, dtype=m_ref.dtype)
        l_ref[...] = jnp.zeros(l_ref.shape, dtype=l_ref.dtype)

    part = jnp.dot(x_ref[...], w_ref[...], preferred_element_type=jnp.float32)

    @pl.when(k == 0)
    def _():
        acc_ref[...] = part + b_ref[...]

    @pl.when(k != 0)
    def _():
        acc_ref[...] += part

    @pl.when(k == pl.num_programs(2) - 1)
    def _():
        z = acc_ref[...]
        m_new = jnp.maximum(m_ref[...], jnp.max(z, axis=-1, keepdims=True))
        l_ref[...] = (jnp.exp(m_ref[...] - m_new) * l_ref[...]
                      + jnp.sum(jnp.exp(z - m_new), axis=-1, keepdims=True))
        m_ref[...] = m_new
        z_ref[...] = z

    @pl.when((j == pl.num_programs(1) - 1) & (k == pl.num_programs(2) - 1))
    def _():
        lse_ref[...] = m_ref[...] + jnp.log(l_ref[...])


# --------------------------------- wrappers ----------------------------------
def prepare_generator_params(weight, bias, compute_dtype=jnp.bfloat16):
    """One-time (parameter-init-time) conversion of torch nn.Linear params.

    weight : (vocab, d_model) -> (d_model, vocab) in `compute_dtype`
    bias   : (vocab,)         -> (1, vocab) float32

    Doing the transpose + cast here (once) instead of inside the forward
    avoids a full HBM read+write of the weight on every call.
    """
    w_t = jnp.asarray(weight).T.astype(compute_dtype)
    b2 = jnp.asarray(bias).astype(jnp.float32).reshape(1, -1)
    return w_t, b2


def generator_forward(x, w_t, bias2d, *, tm: int = 256, tk: int = 512,
                      tv: int = 2048, vmem_limit_bytes: int | None = None):
    """Pallas equivalent of  log_softmax(x @ w_t + bias, axis=-1).

    x      : (..., d_model)
    w_t    : (d_model, vocab)  (pre-transposed, e.g. bf16)
    bias2d : (1, vocab) float32
    returns: (..., vocab) in x.dtype
    """
    *lead, D = x.shape
    Dw, V = w_t.shape
    assert Dw == D, f"d_model mismatch: x has {D}, weight has {Dw}"
    out_dtype = x.dtype

    M = 1
    for d in lead:
        M *= d
    x2 = x.reshape(M, D).astype(w_t.dtype)   # activations -> compute dtype

    if vmem_limit_bytes is None:
        vmem_limit_bytes = _vmem_limit_bytes()

    tm = _choose_tm(M, tm)
    tk = _choose_tk(D, tk)
    Mp = _round_up(M, tm)
    if Mp != M:
        x2 = jnp.pad(x2, ((0, Mp - M), (0, 0)))

    # VMEM working set of the fused (full-vocab) path: f32 acc + double-buffered
    # output / weight / x tiles + resident bias.
    w_item = jnp.dtype(w_t.dtype).itemsize
    fused_bytes = (tm * V * 4
                   + 2 * tm * V * jnp.dtype(out_dtype).itemsize
                   + 2 * V * tk * w_item
                   + 2 * tm * tk * w_item
                   + 2 * V * 4)
    tv_div = _choose_tv(V, tv)
    use_tiled = (tv_div is not None and V // tv_div >= 2
                 and (V > tv or fused_bytes > 0.7 * vmem_limit_bytes))

    if not use_tiled:
        # ---------------- fused full-vocab path ------------------------------
        out = pl.pallas_call(
            _fused_kernel,
            out_shape=jax.ShapeDtypeStruct((Mp, V), out_dtype),
            grid_spec=pltpu.PrefetchScalarGridSpec(
                num_scalar_prefetch=0,
                grid=(Mp // tm, D // tk),
                in_specs=[
                    pl.BlockSpec((tm, tk), lambda i, k: (i, k)),   # x rows
                    pl.BlockSpec((tk, V), lambda i, k: (k, 0)),    # weight (D,V)
                    pl.BlockSpec((1, V), lambda i, k: (0, 0)),     # bias
                ],
                out_specs=pl.BlockSpec((tm, V), lambda i, k: (i, 0)),
                scratch_shapes=[pltpu.VMEM((tm, V), jnp.float32)],
            ),
            compiler_params=pltpu.CompilerParams(
                dimension_semantics=("parallel", "arbitrary"),
                vmem_limit_bytes=vmem_limit_bytes,
            ),
        )(x2, w_t, bias2d)
    else:
        # ---------------- vocab-tiled two-pass path --------------------------
        tvv = tv_div
        logits, lse = pl.pallas_call(
            _tiled_kernel,
            out_shape=(jax.ShapeDtypeStruct((Mp, V), jnp.float32),
                       jax.ShapeDtypeStruct((Mp, 1), jnp.float32)),
            grid_spec=pltpu.PrefetchScalarGridSpec(
                num_scalar_prefetch=0,
                grid=(Mp // tm, V // tvv, D // tk),
                in_specs=[
                    pl.BlockSpec((tm, tk), lambda i, j, k: (i, k)),   # x rows
                    pl.BlockSpec((tk, tvv), lambda i, j, k: (k, j)),  # weight
                    pl.BlockSpec((1, tvv), lambda i, j, k: (0, j)),   # bias
                ],
                out_specs=(
                    pl.BlockSpec((tm, tvv), lambda i, j, k: (i, j)),  # logits
                    pl.BlockSpec((tm, 1), lambda i, j, k: (i, 0)),    # lse
                ),
                scratch_shapes=[pltpu.VMEM((tm, tvv), jnp.float32),
                                pltpu.VMEM((tm, 1), jnp.float32),
                                pltpu.VMEM((tm, 1), jnp.float32)],
            ),
            compiler_params=pltpu.CompilerParams(
                dimension_semantics=("parallel", "arbitrary", "arbitrary"),
                vmem_limit_bytes=vmem_limit_bytes,
            ),
        )(x2, w_t, bias2d)
        # Second pass: lane-dense broadcast subtraction of the per-row LSE.
        out = (logits - lse).astype(out_dtype)

    if Mp != M:
        out = out[:M]
    return out.reshape(*lead, V)


# ----------------------------------- main ------------------------------------
if __name__ == "__main__":
    key = jax.random.PRNGKey(0)

    # ---- test 1: fused full-vocab path (toy Generator shapes) ---------------
    B, S, D, V = 2, 8, 32, 128
    kx, kw, kb, krest = jax.random.split(key, 4)
    x = jax.random.normal(kx, (B, S, D), dtype=jnp.float32)
    weight = jax.random.normal(kw, (V, D), dtype=jnp.float32) / math.sqrt(D)
    bias = jax.random.normal(kb, (V,), dtype=jnp.float32) * 0.01

    w_t, b2 = prepare_generator_params(weight, bias)      # once, at init time
    y = jax.block_until_ready(generator_forward(x, w_t, b2))

    # Reference matching the kernel's bf16-operand / f32-accumulate numerics.
    xe = x.astype(jnp.bfloat16).astype(jnp.float32)
    we = weight.astype(jnp.bfloat16).astype(jnp.float32)
    y_ref = jax.nn.log_softmax(jnp.einsum("bsd,vd->bsv", xe, we) + bias, axis=-1)

    assert y.shape == (B, S, V), f"bad shape {y.shape}"
    assert jnp.allclose(y, y_ref, atol=2e-3, rtol=2e-3), "fused path mismatch"
    assert jnp.allclose(jnp.sum(jnp.exp(y.astype(jnp.float32)), axis=-1),
                        1.0, atol=1e-4), "rows do not normalize"

    # ---- test 2: vocab-tiled two-pass path + K accumulation ------------------
    D2, V2 = 256, 256
    kx2, kw2, kb2 = jax.random.split(krest, 3)
    x2 = jax.random.normal(kx2, (B, S, D2), dtype=jnp.float32)
    weight2 = jax.random.normal(kw2, (V2, D2), dtype=jnp.float32) / math.sqrt(D2)
    bias2 = jax.random.normal(kb2, (V2,), dtype=jnp.float32) * 0.01

    w_t2, b22 = prepare_generator_params(weight2, bias2)
    y2 = jax.block_until_ready(generator_forward(x2, w_t2, b22, tk=128, tv=128))

    x2e = x2.astype(jnp.bfloat16).astype(jnp.float32)
    w2e = weight2.astype(jnp.bfloat16).astype(jnp.float32)
    y2_ref = jax.nn.log_softmax(jnp.einsum("bsd,vd->bsv", x2e, w2e) + bias2,
                                axis=-1)

    assert y2.shape == (B, S, V2), f"bad shape {y2.shape}"
    assert jnp.allclose(y2, y2_ref, atol=2e-3, rtol=2e-3), "tiled path mismatch"
    assert jnp.allclose(jnp.sum(jnp.exp(y2.astype(jnp.float32)), axis=-1),
                        1.0, atol=1e-4), "rows do not normalize (tiled)"

    print("KERNEL_OK")
</pallas_src>

<mosaic_0001>
module attributes {stable_mosaic.version = 11 : i64} {
  func.func @_fused_kernel(%arg0: i32, %arg1: i32, %arg2: memref<8x32xbf16, #tpu.memory_space<vmem>>, %arg3: memref<32x128xbf16, #tpu.memory_space<vmem>>, %arg4: memref<1x128xf32, #tpu.memory_space<vmem>>, %arg5: memref<8x128xf32, #tpu.memory_space<vmem>>, %arg6: memref<8x128xf32, #tpu.memory_space<vmem>>) attributes {dimension_semantics = [#tpu.dimension_semantics<parallel>, #tpu.dimension_semantics<arbitrary>], iteration_bounds = array<i64: 2, 1>, scalar_prefetch = 0 : i64, scratch_operands = 1 : i64, tpu.core_type = #tpu.core_type<tc>, window_params = [{transform_indices = @transform_0, window_bounds = array<i64: 8, 32>}, {transform_indices = @transform_1, window_bounds = array<i64: 32, 128>}, {pipeline_mode = #tpu.pipeline_mode<synchronous>, transform_indices = @transform_2, window_bounds = array<i64: 1, 128>}, {transform_indices = @transform_3, window_bounds = array<i64: 8, 128>}]} {
    %c0 = arith.constant 0 : index
    %c0_0 = arith.constant 0 : index
    %0 = vector.load %arg2[%c0, %c0_0] : memref<8x32xbf16, #tpu.memory_space<vmem>>, vector<8x32xbf16>
    %c0_1 = arith.constant 0 : index
    %c0_2 = arith.constant 0 : index
    %1 = vector.load %arg3[%c0_1, %c0_2] : memref<32x128xbf16, #tpu.memory_space<vmem>>, vector<32x128xbf16>
    %cst = arith.constant dense<0.000000e+00> : vector<8x128xf32>
    %2 = tpu.matmul %0, %1, %cst {dimension_numbers = #tpu.dot_dimension_numbers<[1], [0], [0], [1], [0, 0, 1, 1], [], []>} : vector<8x32xbf16>, vector<32x128xbf16>, vector<8x128xf32> -> vector<8x128xf32>
    %c0_i32 = arith.constant 0 : i32
    %3 = arith.cmpi eq, %arg1, %c0_i32 : i32
    %4 = arith.extui %3 : i1 to i32
    %c0_i32_3 = arith.constant 0 : i32
    %5 = arith.cmpi ne, %4, %c0_i32_3 : i32
    scf.if %5 {
      %c0_8 = arith.constant 0 : index
      %c0_9 = arith.constant 0 : index
      %12 = vector.load %arg4[%c0_8, %c0_9] : memref<1x128xf32, #tpu.memory_space<vmem>>, vector<1x128xf32>
      %13 = vector.broadcast %12 : vector<1x128xf32> to vector<8x128xf32>
      %14 = arith.addf %2, %13 : vector<8x128xf32>
      %c0_10 = arith.constant 0 : index
      %c0_11 = arith.constant 0 : index
      %15 = vector.load %arg6[%c0_10, %c0_11] : memref<8x128xf32, #tpu.memory_space<vmem>>, vector<8x128xf32>
      tpu.vector_store %arg6[%c0_10, %c0_11], %14 {strides = array<i32>} : memref<8x128xf32, #tpu.memory_space<vmem>>, vector<8x128xf32>,
    } else {
    }
    %c0_i32_4 = arith.constant 0 : i32
    %6 = arith.cmpi ne, %arg1, %c0_i32_4 : i32
    %7 = arith.extui %6 : i1 to i32
    %c0_i32_5 = arith.constant 0 : i32
    %8 = arith.cmpi ne, %7, %c0_i32_5 : i32
    scf.if %8 {
      %c0_8 = arith.constant 0 : index
      %c0_9 = arith.constant 0 : index
      %12 = vector.load %arg6[%c0_8, %c0_9] : memref<8x128xf32, #tpu.memory_space<vmem>>, vector<8x128xf32>
      %13 = arith.addf %12, %2 : vector<8x128xf32>
      %c0_10 = arith.constant 0 : index
      %c0_11 = arith.constant 0 : index
      %14 = vector.load %arg6[%c0_10, %c0_11] : memref<8x128xf32, #tpu.memory_space<vmem>>, vector<8x128xf32>
      tpu.vector_store %arg6[%c0_10, %c0_11], %13 {strides = array<i32>} : memref<8x128xf32, #tpu.memory_space<vmem>>, vector<8x128xf32>,
    } else {
    }
    %c0_i32_6 = arith.constant 0 : i32
    %9 = arith.cmpi eq, %arg1, %c0_i32_6 : i32
    %10 = arith.extui %9 : i1 to i32
    %c0_i32_7 = arith.constant 0 : i32
    %11 = arith.cmpi ne, %10, %c0_i32_7 : i32
    scf.if %11 {
      %c0_8 = arith.constant 0 : index
      %c0_9 = arith.constant 0 : index
      %12 = vector.load %arg6[%c0_8, %c0_9] : memref<8x128xf32, #tpu.memory_space<vmem>>, vector<8x128xf32>
      %cst_10 = arith.constant dense<0xFF800000> : vector<8xf32>
      %13 = vector.multi_reduction <maximumf>, %12, %cst_10 [1] : vector<8x128xf32> to vector<8xf32>
      %14 = vector.shape_cast %13 : vector<8xf32> to vector<8x1xf32>
      %15 = vector.broadcast %14 : vector<8x1xf32> to vector<8x128xf32>
      %16 = arith.subf %12, %15 : vector<8x128xf32>
      %17 = math.exp %16 : vector<8x128xf32>
      %cst_11 = arith.constant dense<0.000000e+00> : vector<8xf32>
      %18 = vector.multi_reduction <add>, %17, %cst_11 [1] : vector<8x128xf32> to vector<8xf32>
      %19 = vector.shape_cast %18 : vector<8xf32> to vector<8x1xf32>
      %20 = math.log %19 : vector<8x1xf32>
      %21 = arith.addf %14, %20 : vector<8x1xf32>
      %22 = vector.broadcast %21 : vector<8x1xf32> to vector<8x128xf32>
      %23 = arith.subf %12, %22 : vector<8x128xf32>
      %c0_12 = arith.constant 0 : index
      %c0_13 = arith.constant 0 : index
      %24 = vector.load %arg5[%c0_12, %c0_13] : memref<8x128xf32, #tpu.memory_space<vmem>>, vector<8x128xf32>
      tpu.vector_store %arg5[%c0_12, %c0_13], %23 {strides = array<i32>} : memref<8x128xf32, #tpu.memory_space<vmem>>, vector<8x128xf32>,
    } else {
    }
    return
  }
  func.func @transform_0(%arg0: i32, %arg1: i32) -> (i32, i32) {
    %c0_i32 = arith.constant 0 : i32
    return %arg0, %arg1 : i32, i32
  }
  func.func @transform_1(%arg0: i32, %arg1: i32) -> (i32, i32) {
    %c0_i32 = arith.constant 0 : i32
    %c0_i32_0 = arith.constant 0 : i32
    return %arg1, %c0_i32 : i32, i32
  }
  func.func @transform_2(%arg0: i32, %arg1: i32) -> (i32, i32) {
    %c0_i32 = arith.constant 0 : i32
    %c0_i32_0 = arith.constant 0 : i32
    %c0_i32_1 = arith.constant 0 : i32
    return %c0_i32, %c0_i32_0 : i32, i32
  }
  func.func @transform_3(%arg0: i32, %arg1: i32) -> (i32, i32) {
    %c0_i32 = arith.constant 0 : i32
    %c0_i32_0 = arith.constant 0 : i32
    return %arg0, %c0_i32 : i32, i32
  }
}

</mosaic_0001>

<bundles_post_ra>
// kernel: tpu_custom_call.1
= control target key start
LH: loop header
LB: loop body
LE: loop exit
PB: predicated region body
PF: predicated region fallthrough
CT: control target
= control target key end

     0   :  { %8 = vsyncpa [#allocation4], 0  ;;  %s828_s0 = inlined_call_operand.hbm [shape: bf16[16,32], index: 0, kind: input, shape index: {}]   ;;  %s829_s1 = inlined_call_operand.hbm [shape: bf16[32,128], index: 1, kind: input, shape index: {}]   ;;  %s830_s2 = inlined_call_operand.vmem [shape: f32[1,128], index: 2, kind: input, shape index: {}]   ;;  %s831_s3 = inlined_call_operand.hbm [shape: f32[16,128], index: 3, kind: output, shape index: {}]  }
   0x1   :  { %10 = vsyncpa [#allocation4 + $0x1], 0 }
   0x2   :  { %11 = vsyncpa [#allocation7], 0 }
   0x3   :  { %12 = vsyncpa [#allocation5], 0 }
   0x4   :  { %14 = vsyncpa [#allocation5 + $0x1], 0  ;;  %s681_s12 = smov 0   ;;  %s683_s13 = smov 0  }
   0x5   :  { %s685_s14 = smov 0   ;;  %s687_s15 = smov 0  }
   0x6   :  { %s689_s16 = smov 0   ;;  %s691_s17 = smov 0  }
   0x7 LB: > { %s404_s18 = sadd.s32 4294967295, %s656_s17   ;;  %p406_p0 = scmp.ge.s32.totalorder %s656_s17, 1  ;;  %s656_s17 = sphi %s691_s17, %s20_s17   ;;  %s652_s16 = sphi %s689_s16, %s842_s16   ;;  %s648_s15 = sphi %s687_s15, %s841_s15   ;;  %s644_s14 = sphi %s685_s14, %s840_s14   ;;  %s640_s13 = sphi %s683_s13, %s839_s13   ;;  %s636_s12 = sphi %s681_s12, %s838_s12  }
   0x8   : > { %p713_p1 = scmp.eq.s32.totalorder %s404_s18, 0  ;;  %p138_p2 = scmp.lt.s32.totalorder %s656_s17, 3 }
   0x9   : > { %s152_s22 = sshll.u32 %s829_s1, 4  ;;  %s658_s24 = smov [#allocation6]   ;;  %s153_s22 = int_to_ptr.hbm [resolvable:$true] %s152_s22 }
   0xa   : > { %p721_p3 = pnand %p406_p0, %p138_p2  ;;  %s154_s25 = sshll.u32 %s658_s24, 4  ;;  %s155_s25 = int_to_ptr.vmem [resolvable:$true] %s154_s25 }
   0xb   : > { %p408_p6 = scmp.ge.s32.totalorder %s656_s17, 2  ;;  %s659_s26 = smov 64  }
   0xc   : > { %p438_p4 = pneg %p721_p3  ;;  %s660_s27 = smov 4  }
   0xd   : > { %s405_s28 = sadd.s32 4294967294, %s656_s17   ;;  %s32_s29 = sadd.s32 1, %s652_s16 }
   0xe   : > { %p439_p5 = pnand %p438_p4, %p713_p1  ;;  %s41_s30 = sadd.s32 1, %s644_s14 }
   0xf   : > { %p34_p7 = scmp.ge.s32.totalorder %s32_s29, 2  ;;  %p48_p8 = scmp.ne.s32.totalorder %s644_s14, %s640_s13 }
  0x10   : > { %441 = dma.hbm_to_vmem [thread:$0]  (!%p439_p5), %s153_s22, 256, %s155_s25, [#allocation7], %s659_s26, %s659_s26, %s660_s27  }
  0x11   : > { %p49_p9 = scmp.eq.s32.totalorder %s656_s17, 0  ;;  %p54_p10 = scmp.ne.s32.totalorder %s640_s13, %s636_s12 }
  0x12   : > { %s844_s29 = smov (%p34_p7, %s32_s29), 0  ;;  %p125_p13 = scmp.eq.s32.totalorder %s404_s18, 1 }
  0x13   : > { %p740_p11 = por %p49_p9, %p48_p8  ;;  %p746_p12 = por %p713_p1, %p54_p10 }
  0x14   : > { %s36_s6 = ssub.s32 %s652_s16, %s844_s29  ;;  %p131_p2 = scmp.eq.s32.totalorder %s405_s28, 1 }
  0x15   : > { %p39_p0 = scmp.eq.s32.totalorder %s36_s6, 0  ;;  %p752_p4 = por %p125_p13, %p48_p8 }
  0x16   : > { %p451_p5 = scmp.lt.s32.totalorder %s656_s17, 2  ;;  %p760_p7 = por %p131_p2, %p54_p10 }
  0x17   : > { %s758_s8 = scalar_select %p39_p0, %s644_s14, %s41_s30  }
  0x18   : > { %s171_s10 = sand.u32 1, %s644_s14   ;;  %s410_s20 = sshll.u32 %s652_s16, 2 }
  0x19   : > { %s409_s11 = sshll.u32 %s171_s10, 2  ;;  %s180_s18 = scalar_lea.hbm %s828_s0, %s410_s20 }
  0x1a   : > { %s175_s24 = scalar_lea.vmem [#allocation3], %s409_s11  ;;  %s182_s26 = sshll.u32 %s180_s18, 4  ;;  %s183_s26 = int_to_ptr.hbm [resolvable:$true] %s182_s26 }
  0x1b   : > { %s184_s25 = sshll.u32 %s175_s24, 4  ;;  %p443_p8 = pnand %p451_p5, %p740_p11  ;;  %s185_s25 = int_to_ptr.vmem [resolvable:$true] %s184_s25 }
  0x1c   : > { %s172_s27 = scalar_lea.sflag [#allocation4], %s171_s10  ;;  %193 = sbr.rel (%p721_p3) target bundleno = 431 (0x1af), region = 32 }
  0x1d   : > { %445 = dma.hbm_to_vmem [thread:$0]  (!%p443_p8), %s183_s26, 64, %s185_s25, %s172_s27  }
  0x1e   : > { %s774_s28 = sand.u32 (!%p721_p3), 1, %s640_s13  }
  0x1f   : > { %s412_s30 = sshll.u32 (!%p721_p3), %s774_s28, 2  ;;  %s196_s6 = scalar_lea.sflag (!%p721_p3), [#allocation4], %s774_s28 }
  0x20   : > { %s199_s11 = scalar_lea.vmem (!%p721_p3), [#allocation3], %s412_s30 }
  0x21   : > { %623 = dma.done.wait (%p746_p12), %s196_s6, 64  }
  0x22   : > { %625 = vsyncadd (%p746_p12), %s196_s6, 4294967232 }
  0x23   : > { %627 = dma.done.wait (%p713_p1), [#allocation7], 256  }
  0x24   : > { %629 = vsyncadd (%p713_p1), [#allocation7], 4294967040  ;;  %v429_v0 = vld [vmem:[#allocation6 + $0x8] sm:$0xff]  ;;  %v428_v1 = vld [vmem:[#allocation6] sm:$0xff]  ;;  %vm247_vm0 = vcmask 261120   ;;  %s414_s19 = sshll.u32 %s774_s28, 3 }
  0x25   : > { %257 = vmatpush.bf16.msra.mxu0 %v429_v0  ;;  %v230_v2 = vld [vmem:[%s199_s11] sm:$0xf]  ;;  %s425_s5 = sshll.u32 %s648_s15, 3  ;;  %s227_s22 = scalar_lea.vmem [#allocation8], %s414_s19 }
  0x26   : > { %v505_v3 = vld [vmem:[%s830_s2] ss:$0 sm:$0xff]  ;;  %s308_s21 = scalar_lea.hbm %s831_s3, %s425_s5  ;;  %s310_s18 = sshll.u32 %s227_s22, 4  ;;  %s311_s18 = int_to_ptr.vmem [resolvable:$true] %s310_s18 }
  0x27   : > { %s312_s24 = sshll.u32 %s308_s21, 4  ;;  %s298_s25 = scalar_lea.sflag [#allocation5], %s774_s28  ;;  %s313_s24 = int_to_ptr.hbm [resolvable:$true] %s312_s24 }
  0x28   : > { %s584_s26 = sshra.s32 %s313_s24, 4  ;;  %s590_s6 = scalar_lea.hbm %s831_s3, 16  ;;  %s585_s26 = int_to_ptr.hbm [resolvable:$true] %s584_s26 }
  0x29   : > { %258 = vmatpush.bf16.msra.mxu0 %v428_v1  ;;  %s586_s27 = scalar_lea.hbm %s585_s26, 8  ;;  %p591_p10 = scmp.lt.s32.totalorder %s585_s26, %s831_s3 }
  0x2a   : > { %p587_p1 = scmp.ne.s32.totalorder %s585_s26, %s586_s27  ;;  %p592_p11 = scmp.lt.s32.totalorder %s590_s6, %s586_s27 }
  0x2c   : > { %423 = vmatmul.msk.bf16.vlgmr.msra.gmra.mxu0 %vm247_vm0, %v230_v2  ;;  %p588_p3 = pnand %p587_p1, %p752_p4  ;;  %p593_p12 = por %p592_p11, %p591_p10 }
  0x2e   : > { %p589_p9 = pneg %p588_p3 }
  0x30   : > { %p594_p13 = pnand %p593_p12, %p589_p9 }
  0xa9   : > { %v260_v4 = vpop.f32.mrf.mxu0 }
  0xaa   : > { %v272_v5 = vadd.f32 %v505_v3, %v260_v4 }
  0xac   : > { %285 = vmax.xlane.f32.xlu0 %v272_v5 }
  0xb1   : > { %v262_v6 = vpop.f32.mrf.mxu0 }
 0x11f   : > { %v286_v7 = vpop.xlane.xlu0 %285 }
 0x120   : > { %v287_v8 = vsub.f32 %v272_v5, %v286_v7 }
 0x122   : > { %v288_v9 = vmul.f32 1.442695, %v287_v8 }
 0x124   : > { %506 = vpow2.f32 %v288_v9 }
 0x12a   : > { %v507_v10 = vpop.eup %506 }
 0x12b   : > { %290 = vadd.xlane.f32.xlu0 %v507_v10 }
 0x19e   : > { %v291_v11 = vpop.xlane.xlu0 %290 }
 0x19f   : > { %508 = vlog2.f32 %v291_v11 }
 0x1a5   : > { %v509_v12 = vpop.eup %508 }
 0x1a6   : > { %v293_v13 = vmul.f32 0.6931472, %v509_v12 }
 0x1a8   : > { %v294_v14 = vadd.f32 %v293_v13, %v286_v7 }
 0x1aa   : > { %v295_v15 = vsub.f32 %v272_v5, %v294_v14 }
 0x1ac   : > { %296 = vst [vmem:[%s227_s22] sm:$0xff] %v295_v15 }
 0x1ad   : > { %597 = shalt.err (!%p594_p13)
}
 0x1ae   : > { %436 = dma.vmem_to_hbm [thread:$0]  (%p752_p4), %s311_s18, 128, %s313_s24, %s298_s25  }
 0x1af PF: > { %s324_s28 = sand.u32 1, %s636_s12   ;;  %p447_p0 = pnand %p408_p6, %p760_p7 }
 0x1b0   : > { %s325_s4 = scalar_lea.sflag [#allocation5], %s324_s28 }
 0x1b1   : > { %p448_p2 = pneg %p447_p0 }
 0x1b3   : > { %631 = dma.done.wait (%p448_p2), %s325_s4, 128  }
 0x1b4   : > { %633 = vsyncadd (%p448_p2), %s325_s4, 4294967168  ;;  %s20_s17 = sadd.s32 1, %s656_s17   ;;  %s838_s12 = smov %s640_s13 }
 0x1b5   : > { %p17_p5 = scmp.ge.s32.totalorder %s20_s17, 4   ;;  %s839_s13 = smov %s644_s14 }
 0x1b6   : > { %s840_s14 = smov %s758_s8  ;;  %s841_s15 = smov %s652_s16 }
 0x1b7   : > { %s842_s16 = smov %s844_s29  ;;  %19 = sbr.rel (!%p17_p5) target bundleno = 7 (0x7), region = 94 }
 0x1bc   :  { %331 = vsyncpa [#allocation4], 1 }
 0x1bd   :  { %333 = vsyncpa [#allocation4 + $0x1], 1 }
 0x1be   :  { %334 = vsyncpa [#allocation7], 1 }
 0x1bf   :  { %335 = vsyncpa [#allocation5], 1 }
 0x1c0   :  { %337 = vsyncpa [#allocation5 + $0x1], 1 }

</bundles_post_ra>
